<compile_context>
chip_gen: v7x
topology: tpu7x:2x2x1
jax: 0.10.0
libtpu: 0.0.40
codegen_flags: <defaults>
</compile_context>

<pallas_src>
import jax
import jax.numpy as jnp
from jax.experimental import pallas as pl
from jax.experimental.pallas import tpu as pltpu

EPS = 1e-6


def _round_up(a: int, b: int) -> int:
    return ((a + b - 1) // b) * b


def final_layer_kernel(x_ref, w_ref, b_ref, o_ref):
    # x_ref: (tile_m, D); w_ref: (D, OUT); b_ref: (1, OUT) f32; o_ref: (tile_m, OUT)
    x = x_ref[...].astype(jnp.float32)
    mean = jnp.mean(x, axis=-1, keepdims=True)
    xc = x - mean
    var = jnp.mean(xc * xc, axis=-1, keepdims=True)       # biased variance (nn.LayerNorm)
    # Fused normalize + MXU-operand cast in one traversal (rsqrt rides the EUP slot).
    xn = (xc * jax.lax.rsqrt(var + EPS)).astype(w_ref.dtype)
    y = jnp.dot(xn, w_ref[...], preferred_element_type=jnp.float32)
    o_ref[...] = (y + b_ref[...]).astype(o_ref.dtype)


def prepare_final_layer_params(weight, bias, mxu_dtype=None):
    """One-time parameter layout prep. Hoist & cache this outside the hot path.

    weight: (OUT, D) torch-style; bias: (OUT,).
    mxu_dtype: operand dtype fed to the MXU (default: bf16 weights stay bf16,
               everything else f32).  Pass jnp.bfloat16 explicitly to opt f32
               weights into bf16 MXU operands (stats/accum stay f32).
    Returns w_t: (D, OUT) in mxu_dtype, b_p: (1, OUT) float32.
    """
    weight = jnp.asarray(weight)
    bias = jnp.asarray(bias)
    if mxu_dtype is None:
        mxu_dtype = jnp.bfloat16 if weight.dtype == jnp.bfloat16 else jnp.float32
    w_t = weight.T.astype(mxu_dtype)
    b_p = bias.astype(jnp.float32).reshape(1, -1)
    return w_t, b_p


def _tpu_vmem_capacity_bytes() -> int:
    try:
        cap = int(pltpu.get_tpu_info().vmem_capacity_bytes)
        if cap > 0:
            return cap
    except Exception:
        pass
    return 64 << 20  # conservative fallback (v7x per-TensorCore VMEM)


def _pick_tile_m(D, OUT, in_itemsize, w_itemsize, vmem_cap):
    """Largest row tile fitting ~45% of this generation's VMEM (double-buffered
    I/O blocks + f32 LayerNorm temps + resident parameters)."""
    budget = int(vmem_cap * 0.45)
    fixed = 2 * D * OUT * w_itemsize + 2 * OUT * 4          # weight + bias blocks (worst case)
    per_row = (2 * D * in_itemsize                          # input block (double-buffered)
               + 2 * OUT * in_itemsize                      # output block (double-buffered)
               + 3 * D * 4                                  # f32 temps: x, xc, normalized operand
               + OUT * 4)                                   # f32 matmul accumulator
    avail = max(budget - fixed, 8 * per_row)
    t = avail // per_row
    if t >= 256:
        t = (t // 256) * 256                                # MXU-shaped on v6e/v7x (and 128-aligned)
    else:
        t = max((t // 8) * 8, 8)
    return int(min(t, 1024))                                # HBM-roofline gain flattens past ~1024 rows


def _choose_tile_m(M, tile_cap):
    """Cap the tile at the row count and balance the grid across v7x's two
    TensorCores: prefer an even step count (>=4 when each step stays >=512 rows)."""
    tile_m = max(min(int(tile_cap), _round_up(M, 8)), 8)
    tile_m = _round_up(tile_m, 8)
    steps = pl.cdiv(M, tile_m)
    min_steps = 4 if M >= 4 * 512 else (2 if M >= 2 * 256 else 1)
    steps = max(steps, min_steps)
    if steps > 1 and steps % 2 == 1:
        steps += 1
    return max(_round_up(pl.cdiv(M, steps), 8), 8)


def _vmem_limit_bytes(tile_m, D, OUT, in_itemsize, w_itemsize, vmem_cap):
    est = (2 * tile_m * D * in_itemsize                     # input block (double-buffered)
           + 2 * tile_m * OUT * in_itemsize                 # output block (double-buffered)
           + 2 * D * OUT * w_itemsize + 2 * OUT * 4         # weight + bias (worst case)
           + 3 * tile_m * D * 4 + tile_m * OUT * 4)         # f32 temps + accumulator
    return int(min(max(2 * est, 8 << 20), int(vmem_cap * 0.75)))


def _param_block_spec(shape):
    # Grid-invariant parameter block: fetched once; request single-buffering to
    # return its second buffer to the VMEM budget. Fall back gracefully if this
    # JAX version's BlockSpec lacks pipeline_mode.
    try:
        return pl.BlockSpec(shape, lambda i: (0, 0), pipeline_mode=pl.Buffered(1))
    except Exception:
        return pl.BlockSpec(shape, lambda i: (0, 0))


def final_layer(x, w_t, b_p, *, tile_m=None):
    """x: (..., D); w_t: (D, OUT) and b_p: (1, OUT) from prepare_final_layer_params.
    Returns (..., OUT) in x.dtype."""
    D = x.shape[-1]
    OUT = w_t.shape[1]
    lead = x.shape[:-1]
    x2 = x.reshape(-1, D)                                   # free (row-major) reshape
    M = x2.shape[0]

    in_itemsize = jnp.dtype(x.dtype).itemsize
    w_itemsize = jnp.dtype(w_t.dtype).itemsize
    vmem_cap = _tpu_vmem_capacity_bytes()

    if tile_m is None:
        tile_m = _pick_tile_m(D, OUT, in_itemsize, w_itemsize, vmem_cap)
    tile_m = _choose_tile_m(M, tile_m)
    grid = pl.cdiv(M, tile_m)   # tail block: OOB reads are garbage, OOB writes are dropped

    cost = pl.CostEstimate(
        flops=2 * M * D * OUT + 6 * M * D,
        transcendentals=M,
        bytes_accessed=(M * D * in_itemsize + M * OUT * in_itemsize
                        + D * OUT * w_itemsize + OUT * 4),
    )

    out2 = pl.pallas_call(
        final_layer_kernel,
        out_shape=jax.ShapeDtypeStruct((M, OUT), x.dtype),
        grid_spec=pltpu.PrefetchScalarGridSpec(
            num_scalar_prefetch=0,
            grid=(grid,),
            in_specs=[
                pl.BlockSpec((tile_m, D), lambda i: (i, 0)),    # token tile
                _param_block_spec((D, OUT)),                    # resident weight
                _param_block_spec((1, OUT)),                    # resident bias
            ],
            out_specs=pl.BlockSpec((tile_m, OUT), lambda i: (i, 0)),
        ),
        compiler_params=pltpu.CompilerParams(
            dimension_semantics=("parallel",),
            vmem_limit_bytes=_vmem_limit_bytes(tile_m, D, OUT, in_itemsize,
                                               w_itemsize, vmem_cap),
        ),
        cost_estimate=cost,
    )(x2, w_t, b_p)

    return out2.reshape(*lead, OUT)                          # free reshape, no slice


def final_layer_ref(x, weight, bias):
    xf = x.astype(jnp.float32)
    mean = jnp.mean(xf, axis=-1, keepdims=True)
    var = jnp.mean((xf - mean) ** 2, axis=-1, keepdims=True)
    xn = (xf - mean) / jnp.sqrt(var + EPS)
    y = xn @ weight.astype(jnp.float32).T + bias.astype(jnp.float32)
    return y.astype(x.dtype)


if __name__ == "__main__":
    # Shapes consistent with FinalLayer(latent_dim=4, embed_dim=32, moments_factor=2): OUT = 8.
    B, N, D = 2, 8, 32
    latent_dim, moments_factor = 4, 2
    OUT = int(latent_dim * moments_factor)                   # 8

    key = jax.random.PRNGKey(0)
    kx, kw, kb = jax.random.split(key, 3)
    x = jax.random.normal(kx, (B, N, D), dtype=jnp.float32)
    weight = jax.random.normal(kw, (OUT, D), dtype=jnp.float32) * 0.05   # torch-style (out, in)
    bias = jax.random.normal(kb, (OUT,), dtype=jnp.float32) * 0.05

    # One-time parameter layout prep, hoisted out of the hot path.
    w_t, b_p = prepare_final_layer_params(weight, bias)

    # f32 path.
    out = final_layer(x, w_t, b_p)
    jax.block_until_ready(out)
    ref = final_layer_ref(x, weight, bias)
    assert out.shape == (B, N, OUT)
    assert jnp.allclose(out, ref, atol=1e-5, rtol=1e-5), "f32 mismatch vs reference"

    # Awkward token count: exercises the cdiv tail block (OOB writes masked, no jnp.pad).
    x_odd = jax.random.normal(kx, (2, 7, D), dtype=jnp.float32)
    out_odd = final_layer(x_odd, w_t, b_p)
    jax.block_until_ready(out_odd)
    ref_odd = final_layer_ref(x_odd, weight, bias)
    assert out_odd.shape == (2, 7, OUT)
    assert jnp.allclose(out_odd, ref_odd, atol=1e-5, rtol=1e-5), "odd-M mismatch vs reference"

    # bf16 path: bf16 MXU operands, f32 stats/accumulation (ref does the matmul in f32,
    # hence the relaxed tolerance).
    x_bf = x.astype(jnp.bfloat16)
    w_bf, b_bf = prepare_final_layer_params(weight.astype(jnp.bfloat16),
                                            bias.astype(jnp.bfloat16))
    out_bf = final_layer(x_bf, w_bf, b_bf)
    jax.block_until_ready(out_bf)
    ref_bf = final_layer_ref(x_bf, weight.astype(jnp.bfloat16), bias.astype(jnp.bfloat16))
    assert out_bf.dtype == jnp.bfloat16
    assert jnp.allclose(out_bf.astype(jnp.float32), ref_bf.astype(jnp.float32),
                        atol=5e-2, rtol=5e-2), "bf16 mismatch vs reference"

    print("KERNEL_OK")
</pallas_src>

<mosaic_0001>
module attributes {stable_mosaic.version = 11 : i64} {
  func.func @final_layer_kernel(%arg0: i32, %arg1: memref<16x32xf32, #tpu.memory_space<vmem>>, %arg2: memref<32x8xf32, #tpu.memory_space<vmem>>, %arg3: memref<1x8xf32, #tpu.memory_space<vmem>>, %arg4: memref<16x8xf32, #tpu.memory_space<vmem>>) attributes {dimension_semantics = [#tpu.dimension_semantics<parallel>], iteration_bounds = array<i64: 1>, scalar_prefetch = 0 : i64, scratch_operands = 0 : i64, tpu.core_type = #tpu.core_type<tc>, window_params = [{transform_indices = @transform_0, window_bounds = array<i64: 16, 32>}, {pipeline_mode = #tpu.pipeline_mode<synchronous>, transform_indices = @transform_1, window_bounds = array<i64: 32, 8>}, {pipeline_mode = #tpu.pipeline_mode<synchronous>, transform_indices = @transform_2, window_bounds = array<i64: 1, 8>}, {transform_indices = @transform_3, window_bounds = array<i64: 16, 8>}]} {
    %c0 = arith.constant 0 : index
    %c0_0 = arith.constant 0 : index
    %0 = vector.load %arg1[%c0, %c0_0] : memref<16x32xf32, #tpu.memory_space<vmem>>, vector<16x32xf32>
    %cst = arith.constant dense<0.000000e+00> : vector<16xf32>
    %1 = vector.multi_reduction <add>, %0, %cst [1] : vector<16x32xf32> to vector<16xf32>
    %2 = vector.shape_cast %1 : vector<16xf32> to vector<16x1xf32>
    %cst_1 = arith.constant 3.200000e+01 : f32
    %3 = vector.broadcast %cst_1 : f32 to vector<16x1xf32>
    %4 = arith.divf %2, %3 : vector<16x1xf32>
    %5 = vector.broadcast %4 : vector<16x1xf32> to vector<16x32xf32>
    %6 = arith.subf %0, %5 : vector<16x32xf32>
    %7 = arith.mulf %6, %6 : vector<16x32xf32>
    %cst_2 = arith.constant dense<0.000000e+00> : vector<16xf32>
    %8 = vector.multi_reduction <add>, %7, %cst_2 [1] : vector<16x32xf32> to vector<16xf32>
    %9 = vector.shape_cast %8 : vector<16xf32> to vector<16x1xf32>
    %cst_3 = arith.constant 3.200000e+01 : f32
    %10 = vector.broadcast %cst_3 : f32 to vector<16x1xf32>
    %11 = arith.divf %9, %10 : vector<16x1xf32>
    %cst_4 = arith.constant 9.99999997E-7 : f32
    %12 = vector.broadcast %cst_4 : f32 to vector<16x1xf32>
    %13 = arith.addf %11, %12 : vector<16x1xf32>
    %14 = math.rsqrt %13 : vector<16x1xf32>
    %15 = vector.broadcast %14 : vector<16x1xf32> to vector<16x32xf32>
    %16 = arith.mulf %6, %15 : vector<16x32xf32>
    %c0_5 = arith.constant 0 : index
    %c0_6 = arith.constant 0 : index
    %17 = vector.load %arg2[%c0_5, %c0_6] : memref<32x8xf32, #tpu.memory_space<vmem>>, vector<32x8xf32>
    %cst_7 = arith.constant dense<0.000000e+00> : vector<16x8xf32>
    %18 = tpu.matmul %16, %17, %cst_7 {dimension_numbers = #tpu.dot_dimension_numbers<[1], [0], [0], [1], [0, 0, 1, 1], [], []>} : vector<16x32xf32>, vector<32x8xf32>, vector<16x8xf32> -> vector<16x8xf32>
    %c0_8 = arith.constant 0 : index
    %c0_9 = arith.constant 0 : index
    %19 = vector.load %arg3[%c0_8, %c0_9] : memref<1x8xf32, #tpu.memory_space<vmem>>, vector<1x8xf32>
    %20 = vector.broadcast %19 : vector<1x8xf32> to vector<16x8xf32>
    %21 = arith.addf %18, %20 : vector<16x8xf32>
    %c0_10 = arith.constant 0 : index
    %c0_11 = arith.constant 0 : index
    %22 = vector.load %arg4[%c0_10, %c0_11] : memref<16x8xf32, #tpu.memory_space<vmem>>, vector<16x8xf32>
    tpu.vector_store %arg4[%c0_10, %c0_11], %21 {strides = array<i32>} : memref<16x8xf32, #tpu.memory_space<vmem>>, vector<16x8xf32>,
    return
  }
  func.func @transform_0(%arg0: i32) -> (i32, i32) {
    %c0_i32 = arith.constant 0 : i32
    %c0_i32_0 = arith.constant 0 : i32
    return %arg0, %c0_i32 : i32, i32
  }
  func.func @transform_1(%arg0: i32) -> (i32, i32) {
    %c0_i32 = arith.constant 0 : i32
    %c0_i32_0 = arith.constant 0 : i32
    %c0_i32_1 = arith.constant 0 : i32
    return %c0_i32, %c0_i32_0 : i32, i32
  }
  func.func @transform_2(%arg0: i32) -> (i32, i32) {
    %c0_i32 = arith.constant 0 : i32
    %c0_i32_0 = arith.constant 0 : i32
    %c0_i32_1 = arith.constant 0 : i32
    return %c0_i32, %c0_i32_0 : i32, i32
  }
  func.func @transform_3(%arg0: i32) -> (i32, i32) {
    %c0_i32 = arith.constant 0 : i32
    %c0_i32_0 = arith.constant 0 : i32
    return %arg0, %c0_i32 : i32, i32
  }
}

</mosaic_0001>

<bundles_post_ra>
// kernel: tpu_custom_call.1
= control target key start
LH: loop header
LB: loop body
LE: loop exit
PB: predicated region body
PF: predicated region fallthrough
CT: control target
= control target key end

     0   :  { %vm16_vm0 = vcmask 261120   ;;  %vm136_vm1 = vcmask 64512   ;;  %s228_s0 = inlined_call_operand.vmem [shape: f32[16,32], index: 0, kind: input, shape index: {}]   ;;  %s229_s1 = inlined_call_operand.vmem [shape: f32[32,8], index: 1, kind: input, shape index: {}]   ;;  %s230_s2 = inlined_call_operand.vmem [shape: f32[1,8], index: 2, kind: input, shape index: {}]   ;;  %s231_s3 = inlined_call_operand.vmem [shape: f32[16,8], index: 3, kind: output, shape index: {}]  }
   0x1   :  { %v14_v0 = vld [vmem:[%s228_s0] sm:$0xff]  ;;  %v15_v1 = vld [vmem:[%s228_s0 + $0x8] sm:$0xff]  ;;  %v46_v16 = vld [vmem:[%s229_s1 + $0x10] sm:$0xff] }
   0x2   :  { %v17_v2 = vsel %vm16_vm0, %v14_v0, 0.0  ;;  %v20_v3 = vsel %vm16_vm0, %v15_v1, 0.0  ;;  %v44_v14 = vld [vmem:[%s229_s1] sm:$0xff]  ;;  %v45_v15 = vld [vmem:[%s229_s1 + $0x8] sm:$0xff]  ;;  %v47_v18 = vld [vmem:[%s229_s1 + $0x18] sm:$0xff] }
   0x3   :  { %18 = vadd.xlane.f32.xlu0 %v17_v2  ;;  %v163_v17 = vpack.c.bf16 %v45_v15, %v44_v14  ;;  %v167_v19 = vpack.c.bf16 %v47_v18, %v46_v16  ;;  %v143_v30 = vld [vmem:[%s230_s2] ss:$0 sm:$0xff] }
   0x5   :  { %164 = vmatprep.subr.bf16.mxu0 %v163_v17 }
   0x6   :  { %166 = vmatpush3.bf16.msra.mxu0 %v163_v17 }
   0x7   :  { %21 = vadd.xlane.f32.xlu0 %v20_v3  ;;  %168 = vmatprep.subr.bf16.mxu0 %v167_v19 }
   0xa   :  { %170 = vmatpush3.bf16.msra.mxu0 %v167_v19 }
  0x90   :  { %v19_v4 = vpop.xlane.xlu0 %18 }
  0x91   :  { %v24_v5 = vmul.f32 0.03125, %v19_v4 }
  0x93   :  { %v26_v6 = vsub.f32 %v14_v0, %v24_v5 }
  0x94   :  { %v22_v7 = vpop.xlane.xlu0 %21 }
  0x95   :  { %v25_v8 = vmul.f32 0.03125, %v22_v7  ;;  %v28_v9 = vmul.f32 %v26_v6, %v26_v6 }
  0x97   :  { %v27_v10 = vsub.f32 %v15_v1, %v25_v8  ;;  %v30_v11 = vsel %vm16_vm0, %v28_v9, 0.0 }
  0x98   :  { %31 = vadd.xlane.f32.xlu1 %v30_v11 }
  0x99   :  { %v29_v12 = vmul.f32 %v27_v10, %v27_v10 }
  0x9b   :  { %v33_v13 = vsel %vm16_vm0, %v29_v12, 0.0 }
  0x9c   :  { %34 = vadd.xlane.f32.xlu1 %v33_v13 }
 0x125   :  { %v32_v20 = vpop.xlane.xlu1 %31 }
 0x126   :  { %v36_v21 = vmul.f32 0.03125, %v32_v20 }
 0x128   :  { %v38_v22 = vadd.f32 1e-06, %v36_v21 }
 0x129   :  { %v35_v23 = vpop.xlane.xlu1 %34 }
 0x12a   :  { %171 = vrsqrt.f32 %v38_v22  ;;  %v37_v24 = vmul.f32 0.03125, %v35_v23 }
 0x12c   :  { %v39_v25 = vadd.f32 1e-06, %v37_v24 }
 0x12e   :  { %173 = vrsqrt.f32 %v39_v25 }
 0x134   :  { %v172_v26 = vpop.eup %171 }
 0x135   :  { %v42_v27 = vmul.f32 %v172_v26, %v26_v6 }
 0x137   :  { %160 = vmatprep.mubr.msk.f32.mxu0 %vm16_vm0, %v42_v27 }
 0x138   :  { %v174_v28 = vpop.eup %173 }
 0x139   :  { %v43_v29 = vmul.f32 %v174_v28, %v27_v10 }
 0x13b   :  { %161 = vmatmul.mubr.msk.f32.vlgmr.msra.gmra.mrb[0].mxu0 %vm16_vm0, %v43_v29 }
 0x20e   :  { %v162_v31 = vpop.f32.mrb[0].mxu0 }
 0x20f   :  { %v133_v32 = vadd.f32 %v162_v31, %v143_v30  ;;  %v127_v33 = vpop.f32.mrb[1].mxu0 }
 0x210   :  { %v128_v34 = vadd.f32 %v143_v30, %v127_v33 }
 0x211   :  { %138 = vst.msk [vmem:[%s231_s3 + $0x8] sm:$0xff] %vm136_vm1, %v133_v32 }
 0x212   :  { %137 = vst.msk [vmem:[%s231_s3] sm:$0xff] %vm136_vm1, %v128_v34 }

</bundles_post_ra>
